<compile_context>
chip_gen: v5e
topology: v5e:2x2
jax: 0.10.0
libtpu: 0.0.40
codegen_flags: <defaults>
</compile_context>

<pallas_src>
import functools

import jax
import jax.numpy as jnp
from jax import lax
from jax.experimental import pallas as pl
from jax.experimental.pallas import tpu as pltpu


def _round_up(n, m):
    return ((n + m - 1) // m) * m


def _flash_kernel(q_ref, k_ref, v_ref, o_ref, acc_scr, m_scr, l_scr,
                  *, tq, tk, h_pad, h_out):
    # q_ref:      (1, tq, h_pad) bf16, pre-scaled by 1/sqrt(H)
    # k_ref/v_ref:(1, tk, h_pad) bf16
    # o_ref:      (1, tq, h_out) x.dtype
    qi = pl.program_id(1)
    ki = pl.program_id(2)
    nk = pl.num_programs(2)

    @pl.when(ki == 0)
    def _init():
        m_scr[...] = jnp.full((tq, 1), -1e30, dtype=jnp.float32)
        l_scr[...] = jnp.zeros((tq, 1), dtype=jnp.float32)
        acc_scr[...] = jnp.zeros((tq, h_pad), dtype=jnp.float32)

    def _step(masked):
        k = k_ref[0]                                        # (tk, h_pad) bf16
        v = v_ref[0]                                        # (tk, h_pad) bf16
        # Scores: bf16 x bf16 -> f32 on the MXU, contracting on the head dim.
        s = lax.dot_general(q_ref[0], k,
                            dimension_numbers=(((1,), (1,)), ((), ())),
                            preferred_element_type=jnp.float32)   # (tq, tk)
        if masked:
            # Only diagonal blocks need the causal mask (tq == tk).
            row = qi * tq + lax.broadcasted_iota(jnp.int32, (tq, tk), 0)
            col = ki * tk + lax.broadcasted_iota(jnp.int32, (tq, tk), 1)
            s = jnp.where(col <= row, s, jnp.float32(-1e30))

        # Online softmax update (f32 accumulators in VMEM scratch).
        m_prev = m_scr[...]
        m_new = jnp.maximum(m_prev, jnp.max(s, axis=-1, keepdims=True))
        alpha = jnp.exp(m_prev - m_new)
        p = jnp.exp(s - m_new)
        l_scr[...] = alpha * l_scr[...] + jnp.sum(p, axis=-1, keepdims=True)
        acc_scr[...] = alpha * acc_scr[...] + jnp.dot(
            p.astype(jnp.bfloat16), v, preferred_element_type=jnp.float32)
        m_scr[...] = m_new

    # With tq == tk, block (qi, ki) is either strictly past (ki < qi, no mask),
    # diagonal (ki == qi, masked), or future (ki > qi, skipped — its K/V DMA is
    # also suppressed by the clamped index_map in the wrapper).
    @pl.when(ki == qi)
    def _diagonal():
        _step(masked=True)

    @pl.when(ki < qi)
    def _past():
        _step(masked=False)

    @pl.when(ki == nk - 1)
    def _finalize():
        inv_l = pl.reciprocal(l_scr[...], approx=True)
        o_ref[0] = (acc_scr[...][:, :h_out] * inv_l).astype(o_ref.dtype)


def head_forward(x, w_key, w_query, w_value):
    """x: (B, T, C); w_*: (C, H).  Returns (B, T, H) causal attention output."""
    B, T, C = x.shape
    H = w_key.shape[-1]
    scale = float(H) ** -0.5
    orig_dtype = x.dtype

    # Head dim padded to a lane-dense multiple of 128 for the in-kernel tiles.
    h_pad = _round_up(H, 128)

    # Sequence tiling.  tq == tk is required by the diagonal/past/future block
    # classification and guarantees no fully-masked first block per query row.
    if T <= 512:
        tq = _round_up(T, 8)
    else:
        tq = 512
    # v7x megacore balance: with a tiny batch, make sure B * nq >= 2.
    if B == 1 and T > 256:
        tq = min(tq, 256)
    tk = tq
    t_pad = _round_up(T, tq)
    nq = t_pad // tq
    nk = t_pad // tk

    # ---- QKV projection: hoisted out of the flash kernel, one GEMM done once.
    # 1/sqrt(H) is folded into the query weight (C*H elements, cheapest spot).
    w_qkv = jnp.concatenate([w_query * scale, w_key, w_value], axis=1)  # (C, 3H)
    qkv = jnp.einsum("btc,ch->bth", x, w_qkv)                           # (B, T, 3H) f32
    q, k, v = jnp.split(qkv, 3, axis=-1)

    def _prep(a):
        a = jnp.pad(a, ((0, 0), (0, t_pad - T), (0, h_pad - H)))
        return a.astype(jnp.bfloat16)          # bf16 operands for the MXU

    q_p, k_p, v_p = _prep(q), _prep(k), _prep(v)

    kernel = functools.partial(_flash_kernel, tq=tq, tk=tk,
                               h_pad=h_pad, h_out=H)

    # Clamp the KV block index to the diagonal: future blocks map to the
    # already-resident block, so Pallas issues no DMA for skipped steps.
    kv_map = lambda b, qi, ki: (b, jnp.minimum(ki, qi), 0)

    out = pl.pallas_call(
        kernel,
        out_shape=jax.ShapeDtypeStruct((B, t_pad, H), orig_dtype),
        grid_spec=pltpu.PrefetchScalarGridSpec(
            num_scalar_prefetch=0,
            grid=(B, nq, nk),
            in_specs=[
                pl.BlockSpec((1, tq, h_pad), lambda b, qi, ki: (b, qi, 0)),  # Q
                pl.BlockSpec((1, tk, h_pad), kv_map),                        # K
                pl.BlockSpec((1, tk, h_pad), kv_map),                        # V
            ],
            out_specs=pl.BlockSpec((1, tq, H), lambda b, qi, ki: (b, qi, 0)),
            scratch_shapes=[
                pltpu.VMEM((tq, h_pad), jnp.float32),   # output accumulator
                pltpu.VMEM((tq, 1), jnp.float32),       # running max
                pltpu.VMEM((tq, 1), jnp.float32),       # running sum
            ],
        ),
        compiler_params=pltpu.CompilerParams(
            dimension_semantics=("parallel", "parallel", "arbitrary"),
            vmem_limit_bytes=48 * 1024 * 1024,
        ),
    )(q_p, k_p, v_p)

    return out if t_pad == T else out[:, :T, :]


def head_reference(x, w_key, w_query, w_value):
    """Pure-JAX f32 reference mirroring the PyTorch forward (eval mode)."""
    T = x.shape[1]
    H = w_key.shape[-1]
    k = x @ w_key
    q = x @ w_query
    v = x @ w_value
    wei = (q @ jnp.swapaxes(k, -2, -1)) * (H ** -0.5)
    mask = jnp.tril(jnp.ones((T, T), dtype=bool))
    wei = jnp.where(mask[None, :, :], wei, -jnp.inf)
    wei = jax.nn.softmax(wei, axis=-1)
    return wei @ v


if __name__ == "__main__":
    # Small shapes consistent with the module: batch=2, seq(T)=8, n_embd=32,
    # head_size=16.
    B, T, C, Hs = 2, 8, 32, 16

    key = jax.random.PRNGKey(0)
    kx, kk, kq, kv = jax.random.split(key, 4)

    x = jax.random.normal(kx, (B, T, C), dtype=jnp.float32)
    w_key = jax.random.normal(kk, (C, Hs), dtype=jnp.float32) / jnp.sqrt(C)
    w_query = jax.random.normal(kq, (C, Hs), dtype=jnp.float32) / jnp.sqrt(C)
    w_value = jax.random.normal(kv, (C, Hs), dtype=jnp.float32) / jnp.sqrt(C)

    out = jax.block_until_ready(head_forward(x, w_key, w_query, w_value))
    ref = head_reference(x, w_key, w_query, w_value)
    assert out.shape == (B, T, Hs)
    # bf16 MXU operands -> slightly looser tolerance vs. the f32 reference.
    assert jnp.allclose(out, ref, atol=3e-2, rtol=3e-2), "mismatch (small shape)"

    # Multi-tile flash path: T > tile, sequence padding, past/diagonal blocks,
    # causal DMA skipping.
    T2 = 640
    x2 = jax.random.normal(kx, (B, T2, C), dtype=jnp.float32)
    out2 = jax.block_until_ready(head_forward(x2, w_key, w_query, w_value))
    ref2 = head_reference(x2, w_key, w_query, w_value)
    assert out2.shape == (B, T2, Hs)
    assert jnp.allclose(out2, ref2, atol=3e-2, rtol=3e-2), "mismatch (tiled path)"

    print("KERNEL_OK")
</pallas_src>

<mosaic_0001>
module attributes {stable_mosaic.version = 11 : i64} {
  func.func @_flash_kernel(%arg0: i32, %arg1: i32, %arg2: i32, %arg3: memref<1x8x128xbf16, #tpu.memory_space<vmem>>, %arg4: memref<1x8x128xbf16, #tpu.memory_space<vmem>>, %arg5: memref<1x8x128xbf16, #tpu.memory_space<vmem>>, %arg6: memref<1x8x16xf32, #tpu.memory_space<vmem>>, %arg7: memref<8x128xf32, #tpu.memory_space<vmem>>, %arg8: memref<8x1xf32, #tpu.memory_space<vmem>>, %arg9: memref<8x1xf32, #tpu.memory_space<vmem>>) attributes {dimension_semantics = [#tpu.dimension_semantics<parallel>, #tpu.dimension_semantics<parallel>, #tpu.dimension_semantics<arbitrary>], iteration_bounds = array<i64: 2, 1, 1>, scalar_prefetch = 0 : i64, scratch_operands = 3 : i64, tpu.core_type = #tpu.core_type<tc>, window_params = [{transform_indices = @transform_0, window_bounds = array<i64: 1, 8, 128>}, {transform_indices = @transform_1, window_bounds = array<i64: 1, 8, 128>}, {transform_indices = @transform_2, window_bounds = array<i64: 1, 8, 128>}, {transform_indices = @transform_3, window_bounds = array<i64: 1, 8, 16>}]} {
    %c0_i32 = arith.constant 0 : i32
    %0 = arith.cmpi eq, %arg2, %c0_i32 : i32
    %1 = arith.extui %0 : i1 to i32
    %c0_i32_0 = arith.constant 0 : i32
    %2 = arith.cmpi ne, %1, %c0_i32_0 : i32
    scf.if %2 {
      %cst = arith.constant -1.000000e+30 : f32
      %12 = vector.broadcast %cst : f32 to vector<8x1xf32>
      %c0 = arith.constant 0 : index
      %c0_5 = arith.constant 0 : index
      %13 = vector.load %arg8[%c0, %c0_5] : memref<8x1xf32, #tpu.memory_space<vmem>>, vector<8x1xf32>
      tpu.vector_store %arg8[%c0, %c0_5], %12 {strides = array<i32>} : memref<8x1xf32, #tpu.memory_space<vmem>>, vector<8x1xf32>,
      %cst_6 = arith.constant 0.000000e+00 : f32
      %14 = vector.broadcast %cst_6 : f32 to vector<8x1xf32>
      %c0_7 = arith.constant 0 : index
      %c0_8 = arith.constant 0 : index
      %15 = vector.load %arg9[%c0_7, %c0_8] : memref<8x1xf32, #tpu.memory_space<vmem>>, vector<8x1xf32>
      tpu.vector_store %arg9[%c0_7, %c0_8], %14 {strides = array<i32>} : memref<8x1xf32, #tpu.memory_space<vmem>>, vector<8x1xf32>,
      %cst_9 = arith.constant 0.000000e+00 : f32
      %16 = vector.broadcast %cst_9 : f32 to vector<8x128xf32>
      %c0_10 = arith.constant 0 : index
      %c0_11 = arith.constant 0 : index
      %17 = vector.load %arg7[%c0_10, %c0_11] : memref<8x128xf32, #tpu.memory_space<vmem>>, vector<8x128xf32>
      tpu.vector_store %arg7[%c0_10, %c0_11], %16 {strides = array<i32>} : memref<8x128xf32, #tpu.memory_space<vmem>>, vector<8x128xf32>,
    } else {
    }
    %3 = arith.cmpi eq, %arg2, %arg1 : i32
    %4 = arith.extui %3 : i1 to i32
    %c0_i32_1 = arith.constant 0 : i32
    %5 = arith.cmpi ne, %4, %c0_i32_1 : i32
    scf.if %5 {
      %c0 = arith.constant 0 : index
      %c0_5 = arith.constant 0 : index
      %c0_6 = arith.constant 0 : index
      %12 = vector.load %arg4[%c0, %c0_5, %c0_6] : memref<1x8x128xbf16, #tpu.memory_space<vmem>>, vector<1x8x128xbf16>
      %13 = vector.shape_cast %12 : vector<1x8x128xbf16> to vector<8x128xbf16>
      %c0_7 = arith.constant 0 : index
      %c0_8 = arith.constant 0 : index
      %c0_9 = arith.constant 0 : index
      %14 = vector.load %arg5[%c0_7, %c0_8, %c0_9] : memref<1x8x128xbf16, #tpu.memory_space<vmem>>, vector<1x8x128xbf16>
      %15 = vector.shape_cast %14 : vector<1x8x128xbf16> to vector<8x128xbf16>
      %c0_10 = arith.constant 0 : index
      %c0_11 = arith.constant 0 : index
      %c0_12 = arith.constant 0 : index
      %16 = vector.load %arg3[%c0_10, %c0_11, %c0_12] : memref<1x8x128xbf16, #tpu.memory_space<vmem>>, vector<1x8x128xbf16>
      %17 = vector.shape_cast %16 : vector<1x8x128xbf16> to vector<8x128xbf16>
      %cst = arith.constant dense<0.000000e+00> : vector<8x8xf32>
      %18 = tpu.matmul %17, %13, %cst {dimension_numbers = #tpu.dot_dimension_numbers<[1], [1], [0], [0], [0, 0, 1, 0], [], []>} : vector<8x128xbf16>, vector<8x128xbf16>, vector<8x8xf32> -> vector<8x8xf32>
      %c8_i32 = arith.constant 8 : i32
      %19 = arith.muli %arg1, %c8_i32 : i32
      %20 = tpu.iota {dimensions = array<i32: 0>} : vector<8x8xi32>
      %21 = vector.broadcast %19 : i32 to vector<8x8xi32>
      %22 = arith.addi %21, %20 : vector<8x8xi32>
      %c8_i32_13 = arith.constant 8 : i32
      %23 = arith.muli %arg2, %c8_i32_13 : i32
      %24 = tpu.iota {dimensions = array<i32: 1>} : vector<8x8xi32>
      %25 = vector.broadcast %23 : i32 to vector<8x8xi32>
      %26 = arith.addi %25, %24 : vector<8x8xi32>
      %27 = arith.cmpi sle, %26, %22 : vector<8x8xi32>
      %cst_14 = arith.constant -1.000000e+30 : f32
      %28 = vector.broadcast %cst_14 : f32 to vector<8x8xf32>
      %29 = arith.select %27, %18, %28 : vector<8x8xi1>, vector<8x8xf32>
      %c0_15 = arith.constant 0 : index
      %c0_16 = arith.constant 0 : index
      %30 = vector.load %arg8[%c0_15, %c0_16] : memref<8x1xf32, #tpu.memory_space<vmem>>, vector<8x1xf32>
      %cst_17 = arith.constant dense<0xFF800000> : vector<8xf32>
      %31 = vector.multi_reduction <maximumf>, %29, %cst_17 [1] : vector<8x8xf32> to vector<8xf32>
      %32 = vector.shape_cast %31 : vector<8xf32> to vector<8x1xf32>
      %33 = arith.maximumf %30, %32 : vector<8x1xf32>
      %34 = arith.subf %30, %33 : vector<8x1xf32>
      %35 = math.exp %34 : vector<8x1xf32>
      %36 = vector.broadcast %33 : vector<8x1xf32> to vector<8x8xf32>
      %37 = arith.subf %29, %36 : vector<8x8xf32>
      %38 = math.exp %37 : vector<8x8xf32>
      %c0_18 = arith.constant 0 : index
      %c0_19 = arith.constant 0 : index
      %39 = vector.load %arg9[%c0_18, %c0_19] : memref<8x1xf32, #tpu.memory_space<vmem>>, vector<8x1xf32>
      %40 = arith.mulf %35, %39 : vector<8x1xf32>
      %cst_20 = arith.constant dense<0.000000e+00> : vector<8xf32>
      %41 = vector.multi_reduction <add>, %38, %cst_20 [1] : vector<8x8xf32> to vector<8xf32>
      %42 = vector.shape_cast %41 : vector<8xf32> to vector<8x1xf32>
      %43 = arith.addf %40, %42 : vector<8x1xf32>
      %c0_21 = arith.constant 0 : index
      %c0_22 = arith.constant 0 : index
      %44 = vector.load %arg9[%c0_21, %c0_22] : memref<8x1xf32, #tpu.memory_space<vmem>>, vector<8x1xf32>
      tpu.vector_store %arg9[%c0_21, %c0_22], %43 {strides = array<i32>} : memref<8x1xf32, #tpu.memory_space<vmem>>, vector<8x1xf32>,
      %c0_23 = arith.constant 0 : index
      %c0_24 = arith.constant 0 : index
      %45 = vector.load %arg7[%c0_23, %c0_24] : memref<8x128xf32, #tpu.memory_space<vmem>>, vector<8x128xf32>
      %46 = vector.broadcast %35 : vector<8x1xf32> to vector<8x128xf32>
      %47 = arith.mulf %46, %45 : vector<8x128xf32>
      %48 = arith.truncf %38 : vector<8x8xf32> to vector<8x8xbf16>
      %cst_25 = arith.constant dense<0.000000e+00> : vector<8x128xf32>
      %49 = tpu.matmul %48, %15, %cst_25 {dimension_numbers = #tpu.dot_dimension_numbers<[1], [0], [0], [1], [0, 0, 1, 1], [], []>} : vector<8x8xbf16>, vector<8x128xbf16>, vector<8x128xf32> -> vector<8x128xf32>
      %50 = arith.addf %47, %49 : vector<8x128xf32>
      %c0_26 = arith.constant 0 : index
      %c0_27 = arith.constant 0 : index
      %51 = vector.load %arg7[%c0_26, %c0_27] : memref<8x128xf32, #tpu.memory_space<vmem>>, vector<8x128xf32>
      tpu.vector_store %arg7[%c0_26, %c0_27], %50 {strides = array<i32>} : memref<8x128xf32, #tpu.memory_space<vmem>>, vector<8x128xf32>,
      %c0_28 = arith.constant 0 : index
      %c0_29 = arith.constant 0 : index
      %52 = vector.load %arg8[%c0_28, %c0_29] : memref<8x1xf32, #tpu.memory_space<vmem>>, vector<8x1xf32>
      tpu.vector_store %arg8[%c0_28, %c0_29], %33 {strides = array<i32>} : memref<8x1xf32, #tpu.memory_space<vmem>>, vector<8x1xf32>,
    } else {
    }
    %6 = arith.cmpi slt, %arg2, %arg1 : i32
    %7 = arith.extui %6 : i1 to i32
    %c0_i32_2 = arith.constant 0 : i32
    %8 = arith.cmpi ne, %7, %c0_i32_2 : i32
    scf.if %8 {
      %c0 = arith.constant 0 : index
      %c0_5 = arith.constant 0 : index
      %c0_6 = arith.constant 0 : index
      %12 = vector.load %arg4[%c0, %c0_5, %c0_6] : memref<1x8x128xbf16, #tpu.memory_space<vmem>>, vector<1x8x128xbf16>
      %13 = vector.shape_cast %12 : vector<1x8x128xbf16> to vector<8x128xbf16>
      %c0_7 = arith.constant 0 : index
      %c0_8 = arith.constant 0 : index
      %c0_9 = arith.constant 0 : index
      %14 = vector.load %arg5[%c0_7, %c0_8, %c0_9] : memref<1x8x128xbf16, #tpu.memory_space<vmem>>, vector<1x8x128xbf16>
      %15 = vector.shape_cast %14 : vector<1x8x128xbf16> to vector<8x128xbf16>
      %c0_10 = arith.constant 0 : index
      %c0_11 = arith.constant 0 : index
      %c0_12 = arith.constant 0 : index
      %16 = vector.load %arg3[%c0_10, %c0_11, %c0_12] : memref<1x8x128xbf16, #tpu.memory_space<vmem>>, vector<1x8x128xbf16>
      %17 = vector.shape_cast %16 : vector<1x8x128xbf16> to vector<8x128xbf16>
      %cst = arith.constant dense<0.000000e+00> : vector<8x8xf32>
      %18 = tpu.matmul %17, %13, %cst {dimension_numbers = #tpu.dot_dimension_numbers<[1], [1], [0], [0], [0, 0, 1, 0], [], []>} : vector<8x128xbf16>, vector<8x128xbf16>, vector<8x8xf32> -> vector<8x8xf32>
      %c0_13 = arith.constant 0 : index
      %c0_14 = arith.constant 0 : index
      %19 = vector.load %arg8[%c0_13, %c0_14] : memref<8x1xf32, #tpu.memory_space<vmem>>, vector<8x1xf32>
      %cst_15 = arith.constant dense<0xFF800000> : vector<8xf32>
      %20 = vector.multi_reduction <maximumf>, %18, %cst_15 [1] : vector<8x8xf32> to vector<8xf32>
      %21 = vector.shape_cast %20 : vector<8xf32> to vector<8x1xf32>
      %22 = arith.maximumf %19, %21 : vector<8x1xf32>
      %23 = arith.subf %19, %22 : vector<8x1xf32>
      %24 = math.exp %23 : vector<8x1xf32>
      %25 = vector.broadcast %22 : vector<8x1xf32> to vector<8x8xf32>
      %26 = arith.subf %18, %25 : vector<8x8xf32>
      %27 = math.exp %26 : vector<8x8xf32>
      %c0_16 = arith.constant 0 : index
      %c0_17 = arith.constant 0 : index
      %28 = vector.load %arg9[%c0_16, %c0_17] : memref<8x1xf32, #tpu.memory_space<vmem>>, vector<8x1xf32>
      %29 = arith.mulf %24, %28 : vector<8x1xf32>
      %cst_18 = arith.constant dense<0.000000e+00> : vector<8xf32>
      %30 = vector.multi_reduction <add>, %27, %cst_18 [1] : vector<8x8xf32> to vector<8xf32>
      %31 = vector.shape_cast %30 : vector<8xf32> to vector<8x1xf32>
      %32 = arith.addf %29, %31 : vector<8x1xf32>
      %c0_19 = arith.constant 0 : index
      %c0_20 = arith.constant 0 : index
      %33 = vector.load %arg9[%c0_19, %c0_20] : memref<8x1xf32, #tpu.memory_space<vmem>>, vector<8x1xf32>
      tpu.vector_store %arg9[%c0_19, %c0_20], %32 {strides = array<i32>} : memref<8x1xf32, #tpu.memory_space<vmem>>, vector<8x1xf32>,
      %c0_21 = arith.constant 0 : index
      %c0_22 = arith.constant 0 : index
      %34 = vector.load %arg7[%c0_21, %c0_22] : memref<8x128xf32, #tpu.memory_space<vmem>>, vector<8x128xf32>
      %35 = vector.broadcast %24 : vector<8x1xf32> to vector<8x128xf32>
      %36 = arith.mulf %35, %34 : vector<8x128xf32>
      %37 = arith.truncf %27 : vector<8x8xf32> to vector<8x8xbf16>
      %cst_23 = arith.constant dense<0.000000e+00> : vector<8x128xf32>
      %38 = tpu.matmul %37, %15, %cst_23 {dimension_numbers = #tpu.dot_dimension_numbers<[1], [0], [0], [1], [0, 0, 1, 1], [], []>} : vector<8x8xbf16>, vector<8x128xbf16>, vector<8x128xf32> -> vector<8x128xf32>
      %39 = arith.addf %36, %38 : vector<8x128xf32>
      %c0_24 = arith.constant 0 : index
      %c0_25 = arith.constant 0 : index
      %40 = vector.load %arg7[%c0_24, %c0_25] : memref<8x128xf32, #tpu.memory_space<vmem>>, vector<8x128xf32>
      tpu.vector_store %arg7[%c0_24, %c0_25], %39 {strides = array<i32>} : memref<8x128xf32, #tpu.memory_space<vmem>>, vector<8x128xf32>,
      %c0_26 = arith.constant 0 : index
      %c0_27 = arith.constant 0 : index
      %41 = vector.load %arg8[%c0_26, %c0_27] : memref<8x1xf32, #tpu.memory_space<vmem>>, vector<8x1xf32>
      tpu.vector_store %arg8[%c0_26, %c0_27], %22 {strides = array<i32>} : memref<8x1xf32, #tpu.memory_space<vmem>>, vector<8x1xf32>,
    } else {
    }
    %c0_i32_3 = arith.constant 0 : i32
    %9 = arith.cmpi eq, %arg2, %c0_i32_3 : i32
    %10 = arith.extui %9 : i1 to i32
    %c0_i32_4 = arith.constant 0 : i32
    %11 = arith.cmpi ne, %10, %c0_i32_4 : i32
    scf.if %11 {
      %c0 = arith.constant 0 : index
      %c0_5 = arith.constant 0 : index
      %12 = vector.load %arg9[%c0, %c0_5] : memref<8x1xf32, #tpu.memory_space<vmem>>, vector<8x1xf32>
      %13 = tpu.reciprocal %12 {approx = true} : vector<8x1xf32> -> vector<8x1xf32>
      %c0_6 = arith.constant 0 : index
      %c0_7 = arith.constant 0 : index
      %14 = vector.load %arg7[%c0_6, %c0_7] : memref<8x128xf32, #tpu.memory_space<vmem>>, vector<8x128xf32>
      %15 = vector.extract_strided_slice %14 {offsets = [0, 0], sizes = [8, 16], strides = [1, 1]} : vector<8x128xf32> to vector<8x16xf32>
      %16 = vector.broadcast %13 : vector<8x1xf32> to vector<8x16xf32>
      %17 = arith.mulf %15, %16 : vector<8x16xf32>
      %c0_8 = arith.constant 0 : index
      %c0_9 = arith.constant 0 : index
      %c0_10 = arith.constant 0 : index
      %18 = vector.load %arg6[%c0_8, %c0_9, %c0_10] : memref<1x8x16xf32, #tpu.memory_space<vmem>>, vector<1x8x16xf32>
      %19 = vector.shape_cast %18 : vector<1x8x16xf32> to vector<8x16xf32>
      %20 = vector.shape_cast %17 : vector<8x16xf32> to vector<1x8x16xf32>
      tpu.vector_store %arg6[%c0_8, %c0_9, %c0_10], %20 {strides = array<i32>} : memref<1x8x16xf32, #tpu.memory_space<vmem>>, vector<1x8x16xf32>,
    } else {
    }
    return
  }
  func.func @transform_0(%arg0: i32, %arg1: i32, %arg2: i32) -> (i32, i32, i32) {
    %c0_i32 = arith.constant 0 : i32
    %c0_i32_0 = arith.constant 0 : i32
    return %arg0, %arg1, %c0_i32 : i32, i32, i32
  }
  func.func @transform_1(%arg0: i32, %arg1: i32, %arg2: i32) -> (i32, i32, i32) {
    %0 = arith.minsi %arg2, %arg1 : i32
    %c0_i32 = arith.constant 0 : i32
    %c0_i32_0 = arith.constant 0 : i32
    return %arg0, %0, %c0_i32 : i32, i32, i32
  }
  func.func @transform_2(%arg0: i32, %arg1: i32, %arg2: i32) -> (i32, i32, i32) {
    %0 = arith.minsi %arg2, %arg1 : i32
    %c0_i32 = arith.constant 0 : i32
    %c0_i32_0 = arith.constant 0 : i32
    return %arg0, %0, %c0_i32 : i32, i32, i32
  }
  func.func @transform_3(%arg0: i32, %arg1: i32, %arg2: i32) -> (i32, i32, i32) {
    %c0_i32 = arith.constant 0 : i32
    %c0_i32_0 = arith.constant 0 : i32
    return %arg0, %arg1, %c0_i32 : i32, i32, i32
  }
}

</mosaic_0001>

<bundles_post_ra>
// kernel: tpu_custom_call.1
= control target key start
LH: loop header
LB: loop body
LE: loop exit
PB: predicated region body
PF: predicated region fallthrough
CT: control target
= control target key end

     0   :  { %s1112_s0 = inlined_call_operand.hbm [shape: bf16[2,8,128], index: 0, kind: input, shape index: {}]   ;;  %s1113_s1 = inlined_call_operand.hbm [shape: bf16[2,8,128], index: 1, kind: input, shape index: {}]   ;;  %s1114_s2 = inlined_call_operand.hbm [shape: bf16[2,8,128], index: 2, kind: input, shape index: {}]   ;;  %s1115_s3 = inlined_call_operand.hbm [shape: f32[2,8,16], index: 3, kind: output, shape index: {}]  }
   0x1   :  { %1118 = sst [smem:[#allocation18_spill]] %s1113_s1 }
   0x2   :  { %8 = vsyncpa [#allocation6], 0 }
   0x3   :  { %10 = vsyncpa [#allocation6 + $0x1], 0 }
   0x4   :  { %11 = vsyncpa [#allocation9], 0 }
   0x5   :  { %13 = vsyncpa [#allocation9 + $0x1], 0 }
   0x6   :  { %14 = vsyncpa [#allocation7], 0 }
   0x7   :  { %16 = vsyncpa [#allocation7 + $0x1], 0  ;;  %s947_s12 = smov 0   ;;  %s949_s13 = smov 0  }
   0x8   :  { %s951_s14 = smov 0   ;;  %s953_s15 = smov 0  }
   0x9   :  { %s955_s16 = smov 0   ;;  %s957_s17 = smov 0  }
   0xa LB: > { %1119 = sst [smem:[#allocation15_spill]] %s918_s16  ;;  %s978_s18 = sadd.s32 4294967295, %s922_s17   ;;  %s922_s17 = sphi %s957_s17, %s22_s17   ;;  %s918_s16 = sphi %s955_s16, %s1135_s16   ;;  %s914_s15 = sphi %s953_s15, %s1130_s15   ;;  %s910_s14 = sphi %s951_s14, %s1134_s14   ;;  %s906_s13 = sphi %s949_s13, %s1133_s13   ;;  %s902_s12 = sphi %s947_s12, %s1132_s12  }
   0xb   : > { %s642_s19 = sadd.s32 4294967294, %s922_s17   ;;  %s41_s20 = sadd.s32 1, %s918_s16 }
   0xc   : > { %s50_s21 = sadd.s32 1, %s910_s14  ;;  %p43_p0 = scmp.ge.s32.totalorder %s41_s20, 2 }
   0xd   : > { %p57_p1 = scmp.ne.s32.totalorder %s910_s14, %s906_s13  ;;  %p58_p2 = scmp.eq.s32.totalorder %s922_s17, 0 }
   0xe   : > { %p63_p3 = scmp.ne.s32.totalorder %s906_s13, %s902_s12  ;;  %s1137_s20 = smov (%p43_p0, %s41_s20), 0 }
   0xf   : > { %1120 = sst [smem:[#allocation16_spill]] %s1137_s20  ;;  %p990_p4 = por %p58_p2, %p57_p1 }
  0x10   : > { %p64_p5 = scmp.eq.s32.totalorder %s978_s18, 0  ;;  %s45_s23 = ssub.s32 %s918_s16, %s1137_s20 }
  0x11   : > { %p153_p6 = scmp.eq.s32.totalorder %s978_s18, 1  ;;  %p48_p7 = scmp.eq.s32.totalorder %s45_s23, 0 }
  0x12   : > { %p998_p8 = por %p64_p5, %p63_p3  ;;  %p159_p10 = scmp.eq.s32.totalorder %s642_s19, 1 }
  0x13   : > { %p1002_p9 = por %p153_p6, %p57_p1  ;;  %p644_p12 = scmp.ge.s32.totalorder %s922_s17, 2 }
  0x14   : > { %s1007_s26 = scalar_select %p48_p7, %s910_s14, %s50_s21  }
  0x15   : > { %p1009_p11 = por %p159_p10, %p63_p3  ;;  %p684_p13 = scmp.lt.s32.totalorder %s922_s17, 2 }
  0x16   : > { %1124 = sst [smem:[#allocation17_spill]] %s1007_s26  ;;  %s179_s28 = sand.u32 1, %s910_s14  }
  0x17   : > { %s645_s29 = sshll.u32 %s179_s28, 2  ;;  %s646_s30 = sshll.u32 %s918_s16, 2 }
  0x18   : > { %p1019_p0 = pnand %p684_p13, %p990_p4  ;;  %s199_s5 = sand.u32 1, %s922_s17  }
  0x19   : > { %s1127_s1 = sld [smem:[#allocation18_spill]]  ;;  %s203_s10 = scalar_lea.vmem [#allocation8], %s645_s29 }
  0x1a   : > { %s214_s11 = sshll.u32 %s203_s10, 4  ;;  %s200_s19 = scalar_lea.sflag [#allocation9], %s199_s5  ;;  %s215_s11 = int_to_ptr.vmem [resolvable:$true] %s214_s11 }
  0x1b   : > { %p651_p1 = scmp.ge.s32.totalorder %s922_s17, 1  ;;  %p241_p2 = scmp.lt.s32.totalorder %s922_s17, 3 }
  0x1c   : > { %s188_s6 = scalar_lea.hbm %s1112_s0, %s646_s30  ;;  %s180_s10 = scalar_lea.sflag [#allocation6], %s179_s28 }
  0x1d   : > { %p1031_p3 = pnand %p651_p1, %p241_p2  ;;  %s190_s7 = sshll.u32 %s188_s6, 4  ;;  %s191_s7 = int_to_ptr.hbm [resolvable:$true] %s190_s7 }
  0x1e   : > { %s225_s16 = scalar_lea.vmem [#allocation10], %s645_s29  ;;  %s1048_s22 = sand.u32 (!%p1031_p3), 1, %s906_s13  }
  0x1f   : > { %s210_s8 = scalar_lea.hbm %s1127_s1, %s646_s30  ;;  %s236_s26 = sshll.u32 %s225_s16, 4  ;;  %s237_s26 = int_to_ptr.vmem [resolvable:$true] %s236_s26 }
  0x20   : > { %s212_s9 = sshll.u32 %s210_s8, 4  ;;  %s183_s8 = scalar_lea.vmem [#allocation5], %s645_s29  ;;  %s213_s9 = int_to_ptr.hbm [resolvable:$true] %s212_s9 }
  0x21   : > { %676 = dma.hbm_to_vmem [thread:$0]  (!%p1019_p0), %s213_s9, 64, %s215_s11, %s200_s19  }
  0x22   : > { %s192_s1 = sshll.u32 %s183_s8, 4  ;;  %s232_s11 = scalar_lea.hbm %s1114_s2, %s646_s30  ;;  %s193_s1 = int_to_ptr.vmem [resolvable:$true] %s192_s1 }
  0x23   : > { %673 = dma.hbm_to_vmem [thread:$0]  (!%p1019_p0), %s191_s7, 64, %s193_s1, %s180_s10  }
  0x24   : > { %s234_s20 = sshll.u32 %s232_s11, 4  ;;  %245 = sbr.rel (%p1031_p3) target bundleno = 655 (0x28f), region = 32  ;;  %s235_s20 = int_to_ptr.hbm [resolvable:$true] %s234_s20 }
  0x25   : > { %679 = dma.hbm_to_vmem [thread:$0]  (!%p1019_p0), %s235_s20, 64, %s237_s26, %s200_s19  }
  0x26   : > { %s1051_s1 = sshll.u32 (!%p1031_p3), %s1048_s22, 2  ;;  %s248_s28 = scalar_lea.sflag (!%p1031_p3), [#allocation6], %s1048_s22 }
  0x27   : > { %s251_s30 = scalar_lea.vmem (!%p1031_p3), [#allocation5], %s1051_s1 }
  0x29   : > { %889 = dma.done.wait (%p998_p8), %s248_s28, 64  }
  0x2a   : > { %891 = vsyncadd (%p998_p8), %s248_s28, 4294967232  ;;  %s257_s16 = sand.u32 1, %s978_s18   ;;  %s261_s26 = scalar_lea.vmem [#allocation8], %s1051_s1 }
  0x2b   : > { %s258_s20 = scalar_lea.sflag [#allocation9], %s257_s16 }
  0x2c   : > { %893 = dma.done.wait (%p998_p8), %s258_s20, 128  }
  0x2d   : > { %895 = vsyncadd (%p998_p8), %s258_s20, 4294967168  ;;  %v322_v0 = vld [vmem:[%s261_s26] sm:$0xf]  ;;  %v324_v1 = vld [vmem:[%s251_s30] sm:$0xf]  ;;  %vm314_vm0 = vcmask 7168   ;;  %v339_v3 = vlaneseq }
  0x2e   : > { %332 = vmatpush.bf16.xpose.msra.mxu0 %v322_v0  ;;  %v924_v2 = vmov -1e+30   ;;  %vm351_vm2 = vcmask 64512   ;;  %v925_v10 = vmov 0   ;;  %v926_v11 = vmov 0.0   ;;  %s271_s18 = scalar_lea.vmem [#allocation10], %s1051_s1 }
  0x2f   : > { %315 = vst.msk [vmem:[#allocation3] sm:$0xff] %vm314_vm0, %v924_v2  ;;  %v340_v4 = vshrl.u32 %v339_v3, 7  ;;  %v345_v5 = vand.u32 127, %v339_v3  ;;  %737 = vset.pattern.permute.xlu0 %v925_v10  ;;  %738 = vset.pattern.permute.xlu1 %v925_v10  ;;  %v323_v16 = vld [vmem:[%s271_s18] sm:$0xf]  ;;  %vm386_vm3 = vcmask 1043456  }
  0x30   : > { %739 = vset.pattern.permute.xlu2 %v925_v10  ;;  %316 = vst.msk [vmem:[#allocation4] sm:$0xff] %vm314_vm0, %v926_v11  ;;  %v388_v17 = vsel %vm386_vm3, %v323_v16, 0  ;;  %s655_s24 = sshll.u32 %s1048_s22, 3  ;;  %s659_s29 = sshll.u32 %s914_s15, 3  ;;  %vm494_vm4 = vcmask 130048  }
  0x31   : > { %vm348_vm1 = vcmp.le.s32.totalorder %v345_v5, %v340_v4  ;;  %397 = vmatpush.bf16.msra.mxu1 %v388_v17  ;;  %s508_s21 = scalar_lea.hbm %s1115_s3, %s659_s29  ;;  %s304_s23 = scalar_lea.vmem [#allocation11], %s655_s24 }
  0x32   : > { %s510_s6 = sshll.u32 %s304_s23, 4  ;;  %s512_s7 = sshll.u32 %s508_s21, 4  ;;  %s511_s6 = int_to_ptr.vmem [resolvable:$true] %s510_s6  ;;  %s513_s7 = int_to_ptr.hbm [resolvable:$true] %s512_s7 }
  0x33   : > { %s497_s8 = scalar_lea.sflag [#allocation7], %s1048_s22  ;;  %s850_s10 = sshra.s32 %s513_s7, 4  ;;  %s851_s10 = int_to_ptr.hbm [resolvable:$true] %s850_s10 }
  0x34   : > { %s852_s15 = scalar_lea.hbm %s851_s10, 8  ;;  %s856_s11 = scalar_lea.hbm %s1115_s3, 16 }
  0x35   : > { %333 = vmatmul.bf16.vlgmr.msra.gmra.mxu0 %v324_v1  ;;  %p853_p4 = scmp.ne.s32.totalorder %s851_s10, %s852_s15  ;;  %p857_p7 = scmp.lt.s32.totalorder %s851_s10, %s1115_s3 }
  0x36   : > { %v350_v12 = vld [vmem:[#allocation3] sm:$0xff]  ;;  %p858_p8 = scmp.lt.s32.totalorder %s856_s11, %s852_s15 }
  0x37   : > { %v367_v26 = vld [vmem:[#allocation4] sm:$0xff]  ;;  %p854_p5 = pnand %p853_p4, %p1002_p9 }
  0x38   : > { %p859_p10 = por %p858_p8, %p857_p7 }
  0x39   : > { %p855_p6 = pneg %p854_p5 }
  0x3b   : > { %p860_p13 = pnand %p859_p10, %p855_p6 }
  0xb2   : > { %v334_v6 = vpop.f32.mrf.mxu0 }
  0xb3   : > { %v349_v7 = vsel %vm348_vm1, %v334_v6, -1e+30 }
  0xb4   : > { %v352_v8 = vsel %vm351_vm2, %v349_v7, -inf }
  0xb5   : > { %353 = vmax.xlane.f32.xlu0 %v352_v8 }
  0xba   : > { %v336_v9 = vpop.f32.mrf.mxu0 }
 0x128   : > { %v354_v13 = vpop.xlane.xlu0 %353 }
 0x129   : > { %v355_v14 = vmax.f32 %v350_v12, %v354_v13 }
 0x12b   : > { %v356_v15 = vsub.f32 %v350_v12, %v355_v14  ;;  %405 = vst.msk [vmem:[#allocation3] sm:$0xff] %vm314_vm0, %v355_v14  ;;  %361 = vperm.xlu0 %737, %v355_v14  }
 0x12d   : > { %v357_v24 = vmul.f32 1.442695, %v356_v15 }
 0x19d   : > { %v362_v18 = vpop.permute.xlu0 %361 }
 0x19e   : > { %v364_v19 = vsub.f32 %v349_v7, %v362_v18 }
 0x1a0   : > { %v365_v20 = vmul.f32 1.442695, %v364_v19 }
 0x1a2   : > { %740 = vpow2.f32 %v365_v20 }
 0x1a3   : > { %742 = vpow2.f32 %v357_v24 }
 0x1a8   : > { %v741_v21 = vpop.eup %740 }
 0x1a9   : > { %v369_v22 = vsel %vm351_vm2, %v741_v21, 0.0  ;;  %v382_v23 = vpack.c.bf16 %v741_v21, %v741_v21  ;;  %v743_v25 = vpop.eup %742 }
 0x1aa   : > { %370 = vadd.xlane.f32.xlu1 %v369_v22  ;;  %v368_v27 = vmul.f32 %v743_v25, %v367_v26 }
 0x1ab   : > { %656 = vmatmul.msk.bf16.vlgmr.msra.gmra.mxu1 %vm351_vm2, %v382_v23 }
 0x1c3   : > { %378 = vperm.xlu1 %738, %v743_v25  }
 0x21d   : > { %v371_v28 = vpop.xlane.xlu1 %370 }
 0x21e   : > { %v372_v29 = vadd.f32 %v371_v28, %v368_v27 }
 0x220   : > { %374 = vst.msk [vmem:[#allocation4] sm:$0xff] %vm314_vm0, %v372_v29 }
 0x227   : > { %v485_v30 = vld [vmem:[#allocation4] sm:$0xff] }
 0x228   : > { %v399_v31 = vpop.f32.mrf.mxu1  ;;  %744 = vrcp.f32 %v485_v30 }
 0x22e   : > { %v745_v32 = vpop.eup %744 }
 0x22f   : > { %490 = vperm.xlu2 %739, %v745_v32  }
 0x230   : > { %v401_v33 = vpop.f32.mrf.mxu1 }
 0x235   : > { %v379_v34 = vpop.permute.xlu1 %378 }
 0x236   : > { %v381_v35 = vmul.f32 0.0, %v379_v34 }
 0x238   : > { %v403_v36 = vadd.f32 %v399_v31, %v381_v35 }
 0x289   : > { %v491_v37 = vpop.permute.xlu2 %490 }
 0x28a   : > { %v493_v38 = vmul.f32 %v491_v37, %v403_v36 }
 0x28c   : > { %495 = vst.msk [vmem:[%s304_s23] sm:$0xff] %vm494_vm4, %v493_v38 }
 0x28d   : > { %863 = shalt.err (!%p860_p13)
}
 0x28e   : > { %668 = dma.vmem_to_hbm [thread:$0]  (%p1002_p9), %s511_s6, 128, %s513_s7, %s497_s8  }
 0x28f PF: > { %s524_s22 = sand.u32 1, %s902_s12   ;;  %p681_p0 = pnand %p644_p12, %p1009_p11 }
 0x290   : > { %s525_s30 = scalar_lea.sflag [#allocation7], %s524_s22 }
 0x291   : > { %p682_p1 = pneg %p681_p0 }
 0x293   : > { %897 = dma.done.wait (%p682_p1), %s525_s30, 128  }
 0x294   : > { %899 = vsyncadd (%p682_p1), %s525_s30, 4294967168  ;;  %s22_s17 = sadd.s32 1, %s922_s17   ;;  %s1129_s16 = sld [smem:[#allocation17_spill]] }
 0x295   : > { %p19_p2 = scmp.ge.s32.totalorder %s22_s17, 4   ;;  %s1130_s15 = sld [smem:[#allocation15_spill]] }
 0x296   : > { %s1131_s25 = sld [smem:[#allocation16_spill]]  ;;  %s1132_s12 = smov %s906_s13 }
 0x297   : > { %s1133_s13 = smov %s910_s14 }
 0x298   :  { %21 = sbr.rel (!%p19_p2) target bundleno = 10 (0xa), region = 117 }
 0x29a   : > { %s1134_s14 = smov %s1129_s16 }
 0x29c   : > { %s1135_s16 = smov %s1131_s25 }
 0x29d   :  { %531 = vsyncpa [#allocation6], 1 }
 0x29e   :  { %533 = vsyncpa [#allocation6 + $0x1], 1 }
 0x29f   :  { %534 = vsyncpa [#allocation9], 1 }
 0x2a0   :  { %536 = vsyncpa [#allocation9 + $0x1], 1 }
 0x2a1   :  { %537 = vsyncpa [#allocation7], 1 }
 0x2a2   :  { %539 = vsyncpa [#allocation7 + $0x1], 1 }

</bundles_post_ra>
